<compile_context>
chip_gen: v7x
topology: tpu7x:2x2x1
jax: 0.10.0
libtpu: 0.0.40
codegen_flags: <defaults>
</compile_context>

<pallas_src>
import functools

import jax
import jax.numpy as jnp
from jax.experimental import pallas as pl
from jax.experimental.pallas import tpu as pltpu

LANE = 128            # TPU lane width — only used to pick a tidy 2-D view.
_NUM_DMA_STREAMS = 2  # matches the 2 TensorCores of a v7x chip


def _dma_copy_kernel(rows_per_stream, x_hbm, o_hbm, sem):
    """Copy one contiguous row-chunk of x_hbm into o_hbm with a single DMA."""
    i = pl.program_id(0)
    start = i * rows_per_stream
    cp = pltpu.make_async_copy(
        x_hbm.at[pl.ds(start, rows_per_stream), :],
        o_hbm.at[pl.ds(start, rows_per_stream), :],
        sem,
    )
    cp.start()
    cp.wait()


def identity(x: jax.Array) -> jax.Array:
    """True Identity.forward: zero work — return the input unchanged."""
    return x


def identity_pallas(x: jax.Array) -> jax.Array:
    """Materialize a copy of x with a direct HBM->HBM DMA Pallas kernel.

    Only use this when a fresh output buffer is physically required;
    otherwise call `identity()` (zero work) and skip the kernel entirely.
    """
    total = x.size
    if total == 0:
        return x

    itemsize = jnp.dtype(x.dtype).itemsize

    # 2-D view of the (contiguous) input.  HBM refs have no lane/tile
    # constraints for DMA, so non-128-divisible sizes use the same direct
    # DMA path (shape (1, total)) instead of the old VMEM-staged fallback.
    if total % LANE == 0:
        rows, cols = total // LANE, LANE
    else:
        rows, cols = 1, total

    # One DMA stream per TensorCore when the split is exact; otherwise a
    # single whole-array DMA.
    if rows >= _NUM_DMA_STREAMS and rows % _NUM_DMA_STREAMS == 0:
        num_streams = _NUM_DMA_STREAMS
    else:
        num_streams = 1
    rows_per_stream = rows // num_streams

    x2 = x.reshape(rows, cols)

    out2 = pl.pallas_call(
        functools.partial(_dma_copy_kernel, rows_per_stream),
        out_shape=jax.ShapeDtypeStruct((rows, cols), x.dtype),
        grid_spec=pltpu.PrefetchScalarGridSpec(
            num_scalar_prefetch=0,
            grid=(num_streams,),
            in_specs=[pl.BlockSpec(memory_space=pl.ANY)],   # raw HBM ref
            out_specs=pl.BlockSpec(memory_space=pl.ANY),    # raw HBM ref
            scratch_shapes=[pltpu.SemaphoreType.DMA],
        ),
        compiler_params=pltpu.CompilerParams(
            # Shards the DMA streams across v7x's two TensorCores; harmless
            # (near-zero effect) on single-TC v5e/v6e.
            dimension_semantics=("parallel",),
        ),
        cost_estimate=pl.CostEstimate(
            flops=0,
            transcendentals=0,
            bytes_accessed=2 * total * itemsize,
        ),
    )(x2)

    return out2.reshape(x.shape)


if __name__ == "__main__":
    key = jax.random.PRNGKey(0)

    # Small NCHW-style input, as the original module would see.
    x = jax.random.normal(key, (2, 4, 16, 16), dtype=jnp.float32)

    # Fast path: the real Identity forward is a no-op (zero bytes moved).
    # (Object-identity check is only meaningful outside jit.)
    y_fast = identity(x)
    assert y_fast is x

    # Kernel path: direct HBM->HBM DMA copy, lane-divisible case.
    y = identity_pallas(x)
    jax.block_until_ready(y)
    assert y.shape == x.shape
    assert y.dtype == x.dtype
    assert jnp.array_equal(y, x)

    # Non-lane-divisible shape: exercises the hardened fallback (same direct
    # DMA path, no VMEM staging, no OOM risk).
    x_odd = jax.random.normal(jax.random.PRNGKey(0), (3, 5, 7), dtype=jnp.float32)
    y_odd = identity_pallas(x_odd)
    jax.block_until_ready(y_odd)
    assert jnp.array_equal(y_odd, x_odd)

    print("KERNEL_OK")
</pallas_src>

<mosaic_0001>
module attributes {stable_mosaic.version = 11 : i64} {
  func.func @_dma_copy_kernel(%arg0: i32, %arg1: memref<16x128xf32, #tpu.memory_space<any>>, %arg2: memref<16x128xf32, #tpu.memory_space<any>>, %arg3: memref<!tpu.dma_semaphore, #tpu.memory_space<semaphore_mem>>) attributes {dimension_semantics = [#tpu.dimension_semantics<parallel>], iteration_bounds = array<i64: 2>, scalar_prefetch = 0 : i64, scratch_operands = 1 : i64, tpu.core_type = #tpu.core_type<tc>, window_params = [{}, {}]} {
    %c8_i32 = arith.constant 8 : i32
    %0 = arith.muli %arg0, %c8_i32 : i32
    %c0_i32 = arith.constant 0 : i32
    %1 = tpu.memref_slice %arg1[%0, %c0_i32] : memref<16x128xf32, #tpu.memory_space<any>> -> memref<8x128xf32, #tpu.memory_space<any>>
    %c0_i32_0 = arith.constant 0 : i32
    %2 = tpu.memref_slice %arg2[%0, %c0_i32_0] : memref<16x128xf32, #tpu.memory_space<any>> -> memref<8x128xf32, #tpu.memory_space<any>>
    tpu.enqueue_dma source(%1 : memref<8x128xf32, #tpu.memory_space<any>>) target(%2 : memref<8x128xf32, #tpu.memory_space<any>>) target_semaphore(%arg3 : memref<!tpu.dma_semaphore, #tpu.memory_space<semaphore_mem>>)
    %c0_i32_1 = arith.constant 0 : i32
    %3 = tpu.memref_slice %arg1[%0, %c0_i32_1] : memref<16x128xf32, #tpu.memory_space<any>> -> memref<8x128xf32, #tpu.memory_space<any>>
    %c0_i32_2 = arith.constant 0 : i32
    %4 = tpu.memref_slice %arg2[%0, %c0_i32_2] : memref<16x128xf32, #tpu.memory_space<any>> -> memref<8x128xf32, #tpu.memory_space<any>>
    tpu.wait_dma2 semaphore(%arg3 : memref<!tpu.dma_semaphore, #tpu.memory_space<semaphore_mem>>) src(%3 : memref<8x128xf32, #tpu.memory_space<any>>) dst(%4 : memref<8x128xf32, #tpu.memory_space<any>>)
    return
  }
}

</mosaic_0001>

<bundles_post_ra>
// kernel: tpu_custom_call.1
= control target key start
LH: loop header
LB: loop body
LE: loop exit
PB: predicated region body
PF: predicated region fallthrough
CT: control target
= control target key end

     0   :  { %s72_s6 = smov 0   ;;  %s95_s0 = inlined_call_operand.hbm [shape: f32[16,128], index: 0, kind: input, shape index: {}]   ;;  %s96_s1 = inlined_call_operand.hbm [shape: f32[16,128], index: 1, kind: output, shape index: {}]  }
   0x1 LB: > { %s53_s7 = sshll.u32 %s74_s6, 7  ;;  %s76_s14 = smov [#allocation2]   ;;  %s74_s6 = sphi %s72_s6, %s11_s6  }
   0x2   : > { %s15_s10 = scalar_lea.hbm %s95_s0, %s53_s7  ;;  %s17_s13 = scalar_lea.hbm %s96_s1, %s53_s7 }
   0x3   : > { %s77_s15 = smov [#allocation3]   ;;  %s78_s16 = smov 0  }
   0x4   : > { %30 = dma.general %s15_s10, 128, %s17_s13, %s76_s14, %s77_s15, [#allocation4], %s78_s16, 0  }
   0x5   : > { %70 = dma.done.wait [#allocation2], 128 }
   0x6   : > { %71 = vsyncadd [#allocation2], 4294967168  ;;  %s11_s6 = sadd.s32 1, %s74_s6  }
   0x7   : > { %p8_p0 = scmp.ge.s32.totalorder %s11_s6, 2  }
   0x9   :  { %10 = sbr.rel (!%p8_p0) target bundleno = 1 (0x1), region = 21 }
  0x10   :  { %34 = vsyncmov [#allocation2] }
  0x13   :  { %s35_s17 = vpop.sfrf %34 }
  0x14   :  { %p52_p1 = scmp.ne.s32.totalorder %s35_s17, 0 }
  0x16   :  { %39 = shalt.err (%p52_p1)  }

</bundles_post_ra>
